<compile_context>
chip_gen: v7x
topology: tpu7x:2x2x1
jax: 0.10.0
libtpu: 0.0.40
codegen_flags: <defaults>
</compile_context>

<pallas_src>
import functools
import math

import jax
import jax.numpy as jnp
from jax import lax
from jax.experimental import pallas as pl
from jax.experimental.pallas import tpu as pltpu


# Conservative per-step tile budget: leaves headroom under the v7x 64 MiB/TC
# physical VMEM and under default scoped limits on v5e/v6e.
_VMEM_TILE_BUDGET = 32 * 1024 * 1024


def _round_up(x, n):
    return (x + n - 1) // n * n


def _ffn_kernel(x_ref, w1_ref, b1_ref, w2_ref, b2_ref, g_ref, beta_ref,
                out_ref, acc_ref, *, d_in, eps, mxu_dtype):
    k = pl.program_id(1)
    nk = pl.num_programs(1)

    @pl.when(k == 0)
    def _():
        acc_ref[...] = jnp.zeros_like(acc_ref)

    x = x_ref[...]                                           # (tm, d_in_p)

    # ---- Linear 1 chunk + bias + ReLU (MXU, f32 accumulate) ----
    if mxu_dtype is not None:
        lhs1 = x.astype(mxu_dtype)
        rhs1 = w1_ref[...].astype(mxu_dtype)
    else:
        lhs1 = x
        rhs1 = w1_ref[...]
    h = lax.dot_general(
        lhs1, rhs1,
        dimension_numbers=(((1,), (0,)), ((), ())),
        preferred_element_type=jnp.float32)                  # (tm, tk)
    h = jnp.maximum(h + b1_ref[...].astype(jnp.float32), 0.0)

    # ---- Linear 2 chunk, accumulate into f32 scratch ----
    w2 = w2_ref[...]
    if mxu_dtype is not None:
        lhs2 = h.astype(mxu_dtype)
        rhs2 = w2.astype(mxu_dtype)
    else:
        lhs2 = h.astype(w2.dtype)
        rhs2 = w2
    acc_ref[...] += lax.dot_general(
        lhs2, rhs2,
        dimension_numbers=(((1,), (0,)), ((), ())),
        preferred_element_type=jnp.float32)                  # (tm, d_in_p)

    # ---- Finalize: bias2 + residual + LayerNorm + store ----
    @pl.when(k == nk - 1)
    def _():
        # dropout: identity in eval mode.
        y = acc_ref[...] + b2_ref[...].astype(jnp.float32) + x.astype(
            jnp.float32)
        # Padded d_in columns of y are exactly 0 (zero-padded w2 cols, b2, x),
        # so summing over the padded dim and dividing by the REAL d_in gives
        # the exact mean/variance.  One pass: sum and sum-of-squares.
        inv_n = jnp.float32(1.0 / d_in)
        s = jnp.sum(y, axis=-1, keepdims=True)
        s2 = jnp.sum(y * y, axis=-1, keepdims=True)
        mean = s * inv_n
        var = s2 * inv_n - mean * mean
        inv = lax.rsqrt(var + jnp.float32(eps))              # EUP rsqrt
        out = (y - mean) * inv * g_ref[...].astype(jnp.float32) + beta_ref[
            ...].astype(jnp.float32)
        out_ref[...] = out.astype(out_ref.dtype)


def _vmem_bytes(tm, tk, d_in_p, itemsize):
    """Estimated per-step VMEM footprint (double-buffered I/O + scratch)."""
    x_io = 2 * tm * d_in_p * itemsize           # x row tile (2 buffers)
    out_io = 2 * tm * d_in_p * itemsize         # out row tile (2 buffers)
    w1 = 2 * d_in_p * tk * itemsize             # streamed w1 chunk
    w2 = 2 * tk * d_in_p * itemsize             # streamed w2 chunk
    small = 2 * 8 * (tk + 3 * d_in_p) * itemsize  # b1, b2, gamma, beta
    acc = tm * d_in_p * 4                       # f32 accumulator scratch
    hid = tm * tk * 4                           # f32 hidden chunk (vregs/temps)
    return x_io + out_io + w1 + w2 + small + acc + hid


def _pick_tiles(m, d_in_p, d_hid_p, itemsize):
    """Choose (tm, tk): large row tiles, dtype-aligned, VMEM-bounded."""
    # minimum second-minor multiple for the (packed) input dtype
    sub = {4: 8, 2: 16, 1: 32}.get(itemsize, 8)

    # hidden-dim chunk streamed along the (last, "arbitrary") grid axis;
    # d_hid_p is always a multiple of 128 so 128 always divides it.
    tk = 128
    for cand in (512, 256, 128):
        if d_hid_p % cand == 0:
            tk = cand
            break

    m_aligned = _round_up(max(m, 1), sub)
    tm = sub
    for cand in (1024, 512, 256, 128, 64, 32, 16, 8):
        if cand % sub:
            continue
        if _vmem_bytes(cand, tk, d_in_p, itemsize) <= _VMEM_TILE_BUDGET:
            tm = cand
            break
    if m_aligned <= tm:
        if m_aligned >= 512:
            # enough rows for both v7x TensorCores: keep >= 2 row steps
            tm = _round_up((m_aligned + 1) // 2, sub)
        else:
            tm = m_aligned
    return tm, tk


def _pad2(a, rows, cols):
    pr, pc = rows - a.shape[0], cols - a.shape[1]
    if pr or pc:
        a = jnp.pad(a, ((0, pr), (0, pc)))
    return a


def positionwise_feed_forward(x, w1, b1, w2, b2, gamma, beta, *, eps=1e-6,
                              mxu_dtype=None):
    """x: [..., d_in].  w1: [d_in, d_hid], b1: [d_hid],
    w2: [d_hid, d_in], b2: [d_in], gamma/beta: [d_in].

    mxu_dtype: optional dtype (e.g. jnp.bfloat16) for MXU operands; f32
    accumulation is always used.  None keeps the input dtype (exact)."""
    orig_shape = x.shape
    d_in = orig_shape[-1]
    d_hid = w1.shape[1]
    m = math.prod(orig_shape[:-1])
    itemsize = jnp.dtype(x.dtype).itemsize

    # Lane-dense padding for the feature dims.
    d_in_p = _round_up(d_in, 128)
    d_hid_p = _round_up(d_hid, 128)

    tm, tk = _pick_tiles(m, d_in_p, d_hid_p, itemsize)
    m_p = _round_up(max(m, tm), tm)

    xf = _pad2(x.reshape(m, d_in), m_p, d_in_p)
    w1p = _pad2(w1, d_in_p, d_hid_p)
    w2p = _pad2(w2, d_hid_p, d_in_p)
    b1p = _pad2(b1.reshape(1, d_hid), 1, d_hid_p)
    b2p = _pad2(b2.reshape(1, d_in), 1, d_in_p)
    gp = _pad2(gamma.reshape(1, d_in), 1, d_in_p)
    bp = _pad2(beta.reshape(1, d_in), 1, d_in_p)

    grid = (m_p // tm, d_hid_p // tk)

    needed = _vmem_bytes(tm, tk, d_in_p, itemsize)
    vmem_limit = int(min(max(32 * 1024 * 1024, 1.25 * needed + (1 << 20)),
                         64 * 1024 * 1024))

    kernel = functools.partial(_ffn_kernel, d_in=d_in, eps=float(eps),
                               mxu_dtype=mxu_dtype)

    out_flat = pl.pallas_call(
        kernel,
        out_shape=jax.ShapeDtypeStruct((m_p, d_in_p), x.dtype),
        grid_spec=pltpu.PrefetchScalarGridSpec(
            num_scalar_prefetch=0,
            grid=grid,
            in_specs=[
                pl.BlockSpec((tm, d_in_p), lambda i, k: (i, 0)),    # x rows
                pl.BlockSpec((d_in_p, tk), lambda i, k: (0, k)),    # w1 chunk
                pl.BlockSpec((1, tk), lambda i, k: (0, k)),         # b1 chunk
                pl.BlockSpec((tk, d_in_p), lambda i, k: (k, 0)),    # w2 chunk
                pl.BlockSpec((1, d_in_p), lambda i, k: (0, 0)),     # b2
                pl.BlockSpec((1, d_in_p), lambda i, k: (0, 0)),     # gamma
                pl.BlockSpec((1, d_in_p), lambda i, k: (0, 0)),     # beta
            ],
            out_specs=pl.BlockSpec((tm, d_in_p), lambda i, k: (i, 0)),
            scratch_shapes=[pltpu.VMEM((tm, d_in_p), jnp.float32)],
        ),
        compiler_params=pltpu.CompilerParams(
            dimension_semantics=("parallel", "arbitrary"),
            vmem_limit_bytes=vmem_limit),
    )(xf, w1p, b1p, w2p, b2p, gp, bp)

    return out_flat[:m, :d_in].reshape(orig_shape)


def _reference(x, w1, b1, w2, b2, gamma, beta, eps=1e-6):
    h = jnp.maximum(jnp.dot(x, w1) + b1, 0.0)
    y = jnp.dot(h, w2) + b2 + x
    mean = jnp.mean(y, axis=-1, keepdims=True)
    var = jnp.mean((y - mean) ** 2, axis=-1, keepdims=True)
    return (y - mean) / jnp.sqrt(var + eps) * gamma + beta


if __name__ == "__main__":
    batch, seq, d_in, d_hid = 2, 8, 32, 128

    key = jax.random.PRNGKey(0)
    kx, k1, kb1, k2, kb2, kg, kb = jax.random.split(key, 7)
    x = jax.random.normal(kx, (batch, seq, d_in), dtype=jnp.float32)
    w1 = jax.random.normal(k1, (d_in, d_hid), dtype=jnp.float32) * 0.1
    b1 = jax.random.normal(kb1, (d_hid,), dtype=jnp.float32) * 0.1
    w2 = jax.random.normal(k2, (d_hid, d_in), dtype=jnp.float32) * 0.1
    b2 = jax.random.normal(kb2, (d_in,), dtype=jnp.float32) * 0.1
    gamma = 1.0 + 0.1 * jax.random.normal(kg, (d_in,), dtype=jnp.float32)
    beta = 0.1 * jax.random.normal(kb, (d_in,), dtype=jnp.float32)

    out = positionwise_feed_forward(x, w1, b1, w2, b2, gamma, beta, eps=1e-6)
    out = jax.block_until_ready(out)

    ref = _reference(x, w1, b1, w2, b2, gamma, beta, eps=1e-6)

    assert out.shape == (batch, seq, d_in)
    assert jnp.allclose(out, ref, atol=1e-4, rtol=1e-4), (
        float(jnp.max(jnp.abs(out - ref))))

    print("KERNEL_OK")
</pallas_src>

<mosaic_0001>
module attributes {stable_mosaic.version = 11 : i64} {
  func.func @_ffn_kernel(%arg0: i32, %arg1: i32, %arg2: memref<16x128xf32, #tpu.memory_space<vmem>>, %arg3: memref<128x128xf32, #tpu.memory_space<vmem>>, %arg4: memref<1x128xf32, #tpu.memory_space<vmem>>, %arg5: memref<128x128xf32, #tpu.memory_space<vmem>>, %arg6: memref<1x128xf32, #tpu.memory_space<vmem>>, %arg7: memref<1x128xf32, #tpu.memory_space<vmem>>, %arg8: memref<1x128xf32, #tpu.memory_space<vmem>>, %arg9: memref<16x128xf32, #tpu.memory_space<vmem>>, %arg10: memref<16x128xf32, #tpu.memory_space<vmem>>) attributes {dimension_semantics = [#tpu.dimension_semantics<parallel>, #tpu.dimension_semantics<arbitrary>], iteration_bounds = array<i64: 1, 1>, scalar_prefetch = 0 : i64, scratch_operands = 1 : i64, tpu.core_type = #tpu.core_type<tc>, window_params = [{transform_indices = @transform_0, window_bounds = array<i64: 16, 128>}, {transform_indices = @transform_1, window_bounds = array<i64: 128, 128>}, {transform_indices = @transform_2, window_bounds = array<i64: 1, 128>}, {transform_indices = @transform_3, window_bounds = array<i64: 128, 128>}, {pipeline_mode = #tpu.pipeline_mode<synchronous>, transform_indices = @transform_4, window_bounds = array<i64: 1, 128>}, {pipeline_mode = #tpu.pipeline_mode<synchronous>, transform_indices = @transform_5, window_bounds = array<i64: 1, 128>}, {pipeline_mode = #tpu.pipeline_mode<synchronous>, transform_indices = @transform_6, window_bounds = array<i64: 1, 128>}, {transform_indices = @transform_7, window_bounds = array<i64: 16, 128>}]} {
    %c0_i32 = arith.constant 0 : i32
    %0 = arith.cmpi eq, %arg1, %c0_i32 : i32
    %1 = arith.extui %0 : i1 to i32
    %c0_i32_0 = arith.constant 0 : i32
    %2 = arith.cmpi ne, %1, %c0_i32_0 : i32
    scf.if %2 {
      %cst_16 = arith.constant 0.000000e+00 : f32
      %19 = vector.broadcast %cst_16 : f32 to vector<16x128xf32>
      %c0_17 = arith.constant 0 : index
      %c0_18 = arith.constant 0 : index
      %20 = vector.load %arg10[%c0_17, %c0_18] : memref<16x128xf32, #tpu.memory_space<vmem>>, vector<16x128xf32>
      tpu.vector_store %arg10[%c0_17, %c0_18], %19 {strides = array<i32>} : memref<16x128xf32, #tpu.memory_space<vmem>>, vector<16x128xf32>,
    } else {
    }
    %c0 = arith.constant 0 : index
    %c0_1 = arith.constant 0 : index
    %3 = vector.load %arg2[%c0, %c0_1] : memref<16x128xf32, #tpu.memory_space<vmem>>, vector<16x128xf32>
    %c0_2 = arith.constant 0 : index
    %c0_3 = arith.constant 0 : index
    %4 = vector.load %arg3[%c0_2, %c0_3] : memref<128x128xf32, #tpu.memory_space<vmem>>, vector<128x128xf32>
    %cst = arith.constant dense<0.000000e+00> : vector<16x128xf32>
    %5 = tpu.matmul %3, %4, %cst {dimension_numbers = #tpu.dot_dimension_numbers<[1], [0], [0], [1], [0, 0, 1, 1], [], []>} : vector<16x128xf32>, vector<128x128xf32>, vector<16x128xf32> -> vector<16x128xf32>
    %c0_4 = arith.constant 0 : index
    %c0_5 = arith.constant 0 : index
    %6 = vector.load %arg4[%c0_4, %c0_5] : memref<1x128xf32, #tpu.memory_space<vmem>>, vector<1x128xf32>
    %7 = vector.broadcast %6 : vector<1x128xf32> to vector<16x128xf32>
    %8 = arith.addf %5, %7 : vector<16x128xf32>
    %cst_6 = arith.constant 0.000000e+00 : f32
    %9 = vector.broadcast %cst_6 : f32 to vector<16x128xf32>
    %10 = arith.maximumf %8, %9 : vector<16x128xf32>
    %c0_7 = arith.constant 0 : index
    %c0_8 = arith.constant 0 : index
    %11 = vector.load %arg5[%c0_7, %c0_8] : memref<128x128xf32, #tpu.memory_space<vmem>>, vector<128x128xf32>
    %c0_9 = arith.constant 0 : index
    %c0_10 = arith.constant 0 : index
    %12 = vector.load %arg10[%c0_9, %c0_10] : memref<16x128xf32, #tpu.memory_space<vmem>>, vector<16x128xf32>
    %cst_11 = arith.constant dense<0.000000e+00> : vector<16x128xf32>
    %13 = tpu.matmul %10, %11, %cst_11 {dimension_numbers = #tpu.dot_dimension_numbers<[1], [0], [0], [1], [0, 0, 1, 1], [], []>} : vector<16x128xf32>, vector<128x128xf32>, vector<16x128xf32> -> vector<16x128xf32>
    %14 = arith.addf %12, %13 : vector<16x128xf32>
    %c0_12 = arith.constant 0 : index
    %c0_13 = arith.constant 0 : index
    %15 = vector.load %arg10[%c0_12, %c0_13] : memref<16x128xf32, #tpu.memory_space<vmem>>, vector<16x128xf32>
    tpu.vector_store %arg10[%c0_12, %c0_13], %14 {strides = array<i32>} : memref<16x128xf32, #tpu.memory_space<vmem>>, vector<16x128xf32>,
    %c0_i32_14 = arith.constant 0 : i32
    %16 = arith.cmpi eq, %arg1, %c0_i32_14 : i32
    %17 = arith.extui %16 : i1 to i32
    %c0_i32_15 = arith.constant 0 : i32
    %18 = arith.cmpi ne, %17, %c0_i32_15 : i32
    scf.if %18 {
      %c0_16 = arith.constant 0 : index
      %c0_17 = arith.constant 0 : index
      %19 = vector.load %arg10[%c0_16, %c0_17] : memref<16x128xf32, #tpu.memory_space<vmem>>, vector<16x128xf32>
      %c0_18 = arith.constant 0 : index
      %c0_19 = arith.constant 0 : index
      %20 = vector.load %arg6[%c0_18, %c0_19] : memref<1x128xf32, #tpu.memory_space<vmem>>, vector<1x128xf32>
      %21 = vector.broadcast %20 : vector<1x128xf32> to vector<16x128xf32>
      %22 = arith.addf %19, %21 : vector<16x128xf32>
      %23 = arith.addf %22, %3 : vector<16x128xf32>
      %cst_20 = arith.constant dense<0.000000e+00> : vector<16xf32>
      %24 = vector.multi_reduction <add>, %23, %cst_20 [1] : vector<16x128xf32> to vector<16xf32>
      %25 = vector.shape_cast %24 : vector<16xf32> to vector<16x1xf32>
      %26 = arith.mulf %23, %23 : vector<16x128xf32>
      %cst_21 = arith.constant dense<0.000000e+00> : vector<16xf32>
      %27 = vector.multi_reduction <add>, %26, %cst_21 [1] : vector<16x128xf32> to vector<16xf32>
      %28 = vector.shape_cast %27 : vector<16xf32> to vector<16x1xf32>
      %cst_22 = arith.constant 3.125000e-02 : f32
      %29 = vector.broadcast %cst_22 : f32 to vector<16x1xf32>
      %30 = arith.mulf %25, %29 : vector<16x1xf32>
      %cst_23 = arith.constant 3.125000e-02 : f32
      %31 = vector.broadcast %cst_23 : f32 to vector<16x1xf32>
      %32 = arith.mulf %28, %31 : vector<16x1xf32>
      %33 = arith.mulf %30, %30 : vector<16x1xf32>
      %34 = arith.subf %32, %33 : vector<16x1xf32>
      %cst_24 = arith.constant 9.99999997E-7 : f32
      %35 = vector.broadcast %cst_24 : f32 to vector<16x1xf32>
      %36 = arith.addf %34, %35 : vector<16x1xf32>
      %37 = math.rsqrt %36 : vector<16x1xf32>
      %38 = vector.broadcast %30 : vector<16x1xf32> to vector<16x128xf32>
      %39 = arith.subf %23, %38 : vector<16x128xf32>
      %40 = vector.broadcast %37 : vector<16x1xf32> to vector<16x128xf32>
      %41 = arith.mulf %39, %40 : vector<16x128xf32>
      %c0_25 = arith.constant 0 : index
      %c0_26 = arith.constant 0 : index
      %42 = vector.load %arg7[%c0_25, %c0_26] : memref<1x128xf32, #tpu.memory_space<vmem>>, vector<1x128xf32>
      %43 = vector.broadcast %42 : vector<1x128xf32> to vector<16x128xf32>
      %44 = arith.mulf %41, %43 : vector<16x128xf32>
      %c0_27 = arith.constant 0 : index
      %c0_28 = arith.constant 0 : index
      %45 = vector.load %arg8[%c0_27, %c0_28] : memref<1x128xf32, #tpu.memory_space<vmem>>, vector<1x128xf32>
      %46 = vector.broadcast %45 : vector<1x128xf32> to vector<16x128xf32>
      %47 = arith.addf %44, %46 : vector<16x128xf32>
      %c0_29 = arith.constant 0 : index
      %c0_30 = arith.constant 0 : index
      %48 = vector.load %arg9[%c0_29, %c0_30] : memref<16x128xf32, #tpu.memory_space<vmem>>, vector<16x128xf32>
      tpu.vector_store %arg9[%c0_29, %c0_30], %47 {strides = array<i32>} : memref<16x128xf32, #tpu.memory_space<vmem>>, vector<16x128xf32>,
    } else {
    }
    return
  }
  func.func @transform_0(%arg0: i32, %arg1: i32) -> (i32, i32) {
    %c0_i32 = arith.constant 0 : i32
    %c0_i32_0 = arith.constant 0 : i32
    return %arg0, %c0_i32 : i32, i32
  }
  func.func @transform_1(%arg0: i32, %arg1: i32) -> (i32, i32) {
    %c0_i32 = arith.constant 0 : i32
    %c0_i32_0 = arith.constant 0 : i32
    return %c0_i32, %arg1 : i32, i32
  }
  func.func @transform_2(%arg0: i32, %arg1: i32) -> (i32, i32) {
    %c0_i32 = arith.constant 0 : i32
    %c0_i32_0 = arith.constant 0 : i32
    return %c0_i32, %arg1 : i32, i32
  }
  func.func @transform_3(%arg0: i32, %arg1: i32) -> (i32, i32) {
    %c0_i32 = arith.constant 0 : i32
    %c0_i32_0 = arith.constant 0 : i32
    return %arg1, %c0_i32 : i32, i32
  }
  func.func @transform_4(%arg0: i32, %arg1: i32) -> (i32, i32) {
    %c0_i32 = arith.constant 0 : i32
    %c0_i32_0 = arith.constant 0 : i32
    %c0_i32_1 = arith.constant 0 : i32
    return %c0_i32, %c0_i32_0 : i32, i32
  }
  func.func @transform_5(%arg0: i32, %arg1: i32) -> (i32, i32) {
    %c0_i32 = arith.constant 0 : i32
    %c0_i32_0 = arith.constant 0 : i32
    %c0_i32_1 = arith.constant 0 : i32
    return %c0_i32, %c0_i32_0 : i32, i32
  }
  func.func @transform_6(%arg0: i32, %arg1: i32) -> (i32, i32) {
    %c0_i32 = arith.constant 0 : i32
    %c0_i32_0 = arith.constant 0 : i32
    %c0_i32_1 = arith.constant 0 : i32
    return %c0_i32, %c0_i32_0 : i32, i32
  }
  func.func @transform_7(%arg0: i32, %arg1: i32) -> (i32, i32) {
    %c0_i32 = arith.constant 0 : i32
    %c0_i32_0 = arith.constant 0 : i32
    return %arg0, %c0_i32 : i32, i32
  }
}

</mosaic_0001>

<bundles_post_ra>
// kernel: tpu_custom_call.1
= control target key start
LH: loop header
LB: loop body
LE: loop exit
PB: predicated region body
PF: predicated region fallthrough
CT: control target
= control target key end

     0   :  { %12 = vsyncpa [#allocation4], 0  ;;  %s760_s0 = inlined_call_operand.hbm [shape: f32[16,128], index: 0, kind: input, shape index: {}]   ;;  %s761_s1 = inlined_call_operand.hbm [shape: f32[128,128], index: 1, kind: input, shape index: {}]   ;;  %s762_s2 = inlined_call_operand.vmem [shape: f32[1,128], index: 2, kind: input, shape index: {}]   ;;  %s763_s3 = inlined_call_operand.hbm [shape: f32[128,128], index: 3, kind: input, shape index: {}]   ;;  %s764_s4 = inlined_call_operand.vmem [shape: f32[1,128], index: 4, kind: input, shape index: {}]   ;;  %s765_s5 = inlined_call_operand.vmem [shape: f32[1,128], index: 5, kind: input, shape index: {}]   ;;  %s766_s6 = inlined_call_operand.vmem [shape: f32[1,128], index: 6, kind: input, shape index: {}]   ;;  %s767_s7 = inlined_call_operand.hbm [shape: f32[16,128], index: 7, kind: output, shape index: {}]  }
   0x1   :  { %13 = vsyncpa [#allocation7], 0 }
   0x2   :  { %14 = vsyncpa [#allocation5], 0  ;;  %s631_s24 = smov [#allocation6]   ;;  %s632_s26 = smov [#allocation3]  }
   0x3   :  { %s32_s25 = sshll.u32 %s631_s24, 4  ;;  %s20_s27 = sshll.u32 %s632_s26, 4  ;;  %s33_s25 = int_to_ptr.vmem [resolvable:$true] %s32_s25  ;;  %s677_s27 = int_to_ptr.vmem [resolvable:$true] %s20_s27 }
   0x4   :  { %s537_s30 = scalar_lea.hbm %s761_s1, 2048 }
   0x5   :  { %p538_p0 = scmp.ne.s32.totalorder %s761_s1, %s537_s30  ;;  %p541_p1 = scmp.lt.u32.totalorder %s537_s30, %s761_s1 }
   0x7   :  { %p543_p2 = pnand %p541_p1, %p538_p0 }
   0x9   :  { %546 = shalt.err (!%p543_p2)
}
   0xa   :  { %s547_s12 = scalar_lea.vmem %s33_s25, 2048  ;;  %p552_p4 = scmp.lt.s32.totalorder %s33_s25, %s33_s25 }
   0xb   :  { %p548_p3 = scmp.ne.s32.totalorder %s33_s25, %s547_s12  ;;  %p553_p5 = scmp.lt.s32.totalorder %s547_s12, %s547_s12 }
   0xd   :  { %p554_p6 = por %p553_p5, %p552_p4 }
   0xf   :  { %p555_p7 = pnand %p554_p6, %p548_p3 }
  0x11   :  { %558 = shalt.err (!%p555_p7)
}
  0x12   :  { %s633_s13 = smov 128   ;;  %s634_s14 = smov 8  }
  0x13   :  { %38 = dma.hbm_to_vmem [thread:$0]  %s761_s1, 2048, %s33_s25, [#allocation7], %s633_s13, %s633_s13, %s634_s14  }
  0x14   :  { %s559_s19 = scalar_lea.hbm %s760_s0, 256 }
  0x15   :  { %p560_p8 = scmp.ne.s32.totalorder %s760_s0, %s559_s19  ;;  %p563_p9 = scmp.lt.u32.totalorder %s559_s19, %s760_s0 }
  0x17   :  { %p565_p10 = pnand %p563_p9, %p560_p8 }
  0x19   :  { %568 = shalt.err (!%p565_p10)
}
  0x1a   :  { %s569_s24 = scalar_lea.vmem %s677_s27, 256  ;;  %p574_p12 = scmp.lt.s32.totalorder %s677_s27, %s677_s27 }
  0x1b   :  { %p570_p11 = scmp.ne.s32.totalorder %s677_s27, %s569_s24  ;;  %p575_p13 = scmp.lt.s32.totalorder %s569_s24, %s569_s24 }
  0x1d   :  { %p576_p0 = por %p575_p13, %p574_p12 }
  0x1f   :  { %p577_p1 = pnand %p576_p0, %p570_p11 }
  0x21   :  { %580 = shalt.err (!%p577_p1)
}
  0x22   :  { %26 = dma.hbm_to_vmem [thread:$0]  %s760_s0, 256, %s677_s27, [#allocation4], %s633_s13, %s633_s13, %s634_s14  }
  0x23   :  { %s635_s26 = smov [#allocation8]   ;;  %s581_s8 = scalar_lea.hbm %s763_s3, 2048 }
  0x24   :  { %s46_s28 = sshll.u32 %s635_s26, 4  ;;  %p582_p2 = scmp.ne.s32.totalorder %s763_s3, %s581_s8  ;;  %s47_s28 = int_to_ptr.vmem [resolvable:$true] %s46_s28 }
  0x25   :  { %p585_p3 = scmp.lt.u32.totalorder %s581_s8, %s763_s3 }
  0x27   :  { %p587_p4 = pnand %p585_p3, %p582_p2 }
  0x29   :  { %590 = shalt.err (!%p587_p4)
}
  0x2a   :  { %s591_s15 = scalar_lea.vmem %s47_s28, 2048  ;;  %p596_p6 = scmp.lt.s32.totalorder %s47_s28, %s47_s28 }
  0x2b   :  { %p592_p5 = scmp.ne.s32.totalorder %s47_s28, %s591_s15  ;;  %p597_p7 = scmp.lt.s32.totalorder %s591_s15, %s591_s15 }
  0x2d   :  { %p598_p8 = por %p597_p7, %p596_p6 }
  0x2f   :  { %p599_p9 = pnand %p598_p8, %p592_p5 }
  0x31   :  { %602 = shalt.err (!%p599_p9)
}
  0x32   :  { %52 = dma.hbm_to_vmem [thread:$0]  %s763_s3, 2048, %s47_s28, [#allocation7], %s633_s13, %s633_s13, %s634_s14  }
  0x33   :  { %625 = dma.done.wait [#allocation4], 256  }
  0x34   :  { %626 = vsyncadd [#allocation4], 4294967040 }
  0x35   :  { %627 = dma.done.wait [#allocation7], 4096  }
  0x36   :  { %628 = vsyncadd [#allocation7], 4294963200  ;;  %v76_v0 = vld [vmem:[#allocation6] sm:$0xff]  ;;  %v77_v1 = vld [vmem:[#allocation6 + $0x8] sm:$0xff]  ;;  %s636_s21 = smov [#allocation9]  }
  0x37   :  { %v78_v2 = vld [vmem:[#allocation6 + $0x10] sm:$0xff]  ;;  %v463_v3 = vpack.c.bf16 %v77_v1, %v76_v0  ;;  %v79_v4 = vld [vmem:[#allocation6 + $0x18] sm:$0xff]  ;;  %v80_v6 = vld [vmem:[#allocation6 + $0x20] sm:$0xff]  ;;  %s340_s22 = sshll.u32 %s636_s21, 4  ;;  %s341_s22 = int_to_ptr.vmem [resolvable:$true] %s340_s22 }
  0x38   :  { %v467_v5 = vpack.c.bf16 %v79_v4, %v78_v2  ;;  %v81_v7 = vld [vmem:[#allocation6 + $0x28] sm:$0xff]  ;;  %v82_v9 = vld [vmem:[#allocation6 + $0x30] sm:$0xff]  ;;  %v83_v10 = vld [vmem:[#allocation6 + $0x38] sm:$0xff]  ;;  %s603_s23 = scalar_lea.vmem %s341_s22, 256  ;;  %p608_p11 = scmp.lt.s32.totalorder %s341_s22, %s341_s22 }
  0x39   :  { %464 = vmatprep.subr.bf16.mxu0 %v463_v3  ;;  %v471_v8 = vpack.c.bf16 %v81_v7, %v80_v6  ;;  %v729_v11 = vld [vmem:[#allocation3] sm:$0xff]  ;;  %v176_v12 = vld [vmem:[#allocation8] sm:$0xff]  ;;  %v177_v13 = vld [vmem:[#allocation8 + $0x8] sm:$0xff]  ;;  %v475_v20 = vpack.c.bf16 %v83_v10, %v82_v9  ;;  %p604_p10 = scmp.ne.s32.totalorder %s341_s22, %s603_s23  ;;  %p609_p12 = scmp.lt.s32.totalorder %s603_s23, %s603_s23 }
  0x3a   :  { %466 = vmatpush3.bf16.msra.mxu0 %v463_v3  ;;  %425 = vmatprep.mubr.f32.mxu0 %v729_v11  ;;  %v178_v14 = vld [vmem:[#allocation8 + $0x10] sm:$0xff]  ;;  %v495_v15 = vpack.c.bf16 %v177_v13, %v176_v12  ;;  %v179_v16 = vld [vmem:[#allocation8 + $0x18] sm:$0xff]  ;;  %v180_v18 = vld [vmem:[#allocation8 + $0x20] sm:$0xff] }
  0x3b   :  { %468 = vmatprep.subr.bf16.mxu0 %v467_v5  ;;  %v499_v17 = vpack.c.bf16 %v179_v16, %v178_v14  ;;  %v181_v19 = vld [vmem:[#allocation8 + $0x28] sm:$0xff]  ;;  %v84_v21 = vld [vmem:[#allocation6 + $0x40] sm:$0xff]  ;;  %v182_v24 = vld [vmem:[#allocation8 + $0x30] sm:$0xff]  ;;  %p610_p13 = por %p609_p12, %p608_p11 }
  0x3c   :  { %496 = vmatprep.subr.bf16.mxu1 %v495_v15  ;;  %v85_v22 = vld [vmem:[#allocation6 + $0x48] sm:$0xff]  ;;  %v503_v23 = vpack.c.bf16 %v181_v19, %v180_v18  ;;  %v183_v25 = vld [vmem:[#allocation8 + $0x38] sm:$0xff]  ;;  %v86_v27 = vld [vmem:[#allocation6 + $0x50] sm:$0xff] }
  0x3d   :  { %498 = vmatpush3.bf16.msra.mxu1 %v495_v15  ;;  %v479_v26 = vpack.c.bf16 %v85_v22, %v84_v21  ;;  %v87_v28 = vld [vmem:[#allocation6 + $0x58] sm:$0xff]  ;;  %v507_v29 = vpack.c.bf16 %v183_v25, %v182_v24  ;;  %v184_v30 = vld [vmem:[#allocation8 + $0x40] sm:$0xff]  ;;  %v185_v31 = vld [vmem:[#allocation8 + $0x48] sm:$0xff]  ;;  %p611_p0 = pnand %p610_p13, %p604_p10 }
  0x3e   :  { %470 = vmatpush3.bf16.msra.mxu0 %v467_v5  ;;  %500 = vmatprep.subr.bf16.mxu1 %v499_v17  ;;  %v483_v32 = vpack.c.bf16 %v87_v28, %v86_v27  ;;  %v88_v33 = vld [vmem:[#allocation6 + $0x60] sm:$0xff]  ;;  %v89_v34 = vld [vmem:[#allocation6 + $0x68] sm:$0xff]  ;;  %v511_v35 = vpack.c.bf16 %v185_v31, %v184_v30  ;;  %v186_v36 = vld [vmem:[#allocation8 + $0x50] sm:$0xff] }
  0x3f   :  { %472 = vmatprep.subr.bf16.mxu0 %v471_v8  ;;  %v187_v37 = vld [vmem:[#allocation8 + $0x58] sm:$0xff]  ;;  %v487_v38 = vpack.c.bf16 %v89_v34, %v88_v33  ;;  %v90_v39 = vld [vmem:[#allocation6 + $0x70] sm:$0xff]  ;;  %v188_v42 = vld [vmem:[#allocation8 + $0x60] sm:$0xff] }
  0x40   :  { %v91_v40 = vld [vmem:[#allocation6 + $0x78] sm:$0xff]  ;;  %v515_v41 = vpack.c.bf16 %v187_v37, %v186_v36  ;;  %v189_v43 = vld [vmem:[#allocation8 + $0x68] sm:$0xff]  ;;  %v190_v47 = vld [vmem:[#allocation8 + $0x70] sm:$0xff] }
  0x41   :  { %502 = vmatpush3.bf16.msra.mxu1 %v499_v17  ;;  %v491_v44 = vpack.c.bf16 %v91_v40, %v90_v39  ;;  %v519_v45 = vpack.c.bf16 %v189_v43, %v188_v42  ;;  %v75_v46 = vld [vmem:[#allocation3 + $0x8] sm:$0xff]  ;;  %v353_v50 = vld [vmem:[%s762_s2] ss:$0 sm:$0xff] }
  0x42   :  { %474 = vmatpush3.bf16.msra.mxu0 %v471_v8  ;;  %504 = vmatprep.subr.bf16.mxu1 %v503_v23  ;;  %v191_v48 = vld [vmem:[#allocation8 + $0x78] sm:$0xff]  ;;  %v354_v57 = vld [vmem:[%s764_s4] ss:$0 sm:$0xff] }
  0x43   :  { %476 = vmatprep.subr.bf16.mxu0 %v475_v20  ;;  %v523_v49 = vpack.c.bf16 %v191_v48, %v190_v47  ;;  %v355_v18 = vld [vmem:[%s765_s5] ss:$0 sm:$0xff] }
  0x45   :  { %506 = vmatpush3.bf16.msra.mxu1 %v503_v23 }
  0x46   :  { %478 = vmatpush3.bf16.msra.mxu0 %v475_v20  ;;  %508 = vmatprep.subr.bf16.mxu1 %v507_v29  ;;  %v356_v20 = vld [vmem:[%s766_s6] ss:$0 sm:$0xff] }
  0x47   :  { %480 = vmatprep.subr.bf16.mxu0 %v479_v26 }
  0x49   :  { %510 = vmatpush3.bf16.msra.mxu1 %v507_v29 }
  0x4a   :  { %482 = vmatpush3.bf16.msra.mxu0 %v479_v26  ;;  %512 = vmatprep.subr.bf16.mxu1 %v511_v35 }
  0x4b   :  { %484 = vmatprep.subr.bf16.mxu0 %v483_v32 }
  0x4d   :  { %514 = vmatpush3.bf16.msra.mxu1 %v511_v35 }
  0x4e   :  { %486 = vmatpush3.bf16.msra.mxu0 %v483_v32  ;;  %516 = vmatprep.subr.bf16.mxu1 %v515_v41 }
  0x4f   :  { %488 = vmatprep.subr.bf16.mxu0 %v487_v38 }
  0x51   :  { %518 = vmatpush3.bf16.msra.mxu1 %v515_v41 }
  0x52   :  { %490 = vmatpush3.bf16.msra.mxu0 %v487_v38  ;;  %520 = vmatprep.subr.bf16.mxu1 %v519_v45 }
  0x53   :  { %492 = vmatprep.subr.bf16.mxu0 %v491_v44 }
  0x55   :  { %522 = vmatpush3.bf16.msra.mxu1 %v519_v45 }
  0x56   :  { %494 = vmatpush3.bf16.msra.mxu0 %v491_v44  ;;  %524 = vmatprep.subr.bf16.mxu1 %v523_v49 }
  0x59   :  { %426 = vmatmul.mubr.f32.vlgmr.msra.gmra.mrb[0].mxu0 %v75_v46  ;;  %526 = vmatpush3.bf16.msra.mxu1 %v523_v49 }
 0x12c   :  { %v427_v51 = vpop.f32.mrb[0].mxu0 }
 0x12d   :  { %v171_v52 = vadd.f32 %v427_v51, %v353_v50  ;;  %v165_v53 = vpop.f32.mrb[1].mxu0 }
 0x12e   :  { %v166_v54 = vadd.f32 %v353_v50, %v165_v53 }
 0x12f   :  { %v175_v56 = vmax.f32 %v171_v52, 0.0 }
 0x130   :  { %v174_v55 = vmax.f32 %v166_v54, 0.0 }
 0x132   :  { %460 = vmatprep.mubr.f32.mxu1 %v174_v55 }
 0x133   :  { %461 = vmatmul.mubr.f32.vlgmr.msra.gmra.mrb[0].mxu1 %v175_v56 }
 0x206   :  { %v462_v58 = vpop.f32.mrb[0].mxu1 }
 0x207   :  { %v260_v59 = vpop.f32.mrb[1].mxu1  ;;  %v286_v60 = vadd.f32 %v462_v58, %v354_v57 }
 0x208   :  { %v285_v61 = vadd.f32 %v354_v57, %v260_v59 }
 0x209   :  { %v288_v63 = vadd.f32 %v286_v60, %v75_v46 }
 0x20a   :  { %v287_v62 = vadd.f32 %v285_v61, %v729_v11 }
 0x20b   :  { %v294_v1 = vmul.f32 %v288_v63, %v288_v63 }
 0x20c   :  { %289 = vadd.xlane.f32.xlu0 %v287_v62  ;;  %v293_v0 = vmul.f32 %v287_v62, %v287_v62 }
 0x20e   :  { %295 = vadd.xlane.f32.xlu1 %v293_v0 }
 0x210   :  { %291 = vadd.xlane.f32.xlu0 %v288_v63 }
 0x212   :  { %297 = vadd.xlane.f32.xlu1 %v294_v1 }
 0x299   :  { %v290_v2 = vpop.xlane.xlu0 %289 }
 0x29a   :  { %v299_v3 = vmul.f32 0.03125, %v290_v2 }
 0x29b   :  { %v296_v4 = vpop.xlane.xlu1 %295 }
 0x29c   :  { %v303_v5 = vmul.f32 %v299_v3, %v299_v3  ;;  %v301_v6 = vmul.f32 0.03125, %v296_v4  ;;  %v311_v16 = vsub.f32 %v287_v62, %v299_v3 }
 0x29d   :  { %v292_v7 = vpop.xlane.xlu0 %291 }
 0x29e   :  { %v305_v8 = vsub.f32 %v301_v6, %v303_v5  ;;  %v300_v9 = vmul.f32 0.03125, %v292_v7 }
 0x29f   :  { %v298_v10 = vpop.xlane.xlu1 %297 }
 0x2a0   :  { %v307_v12 = vadd.f32 1e-06, %v305_v8  ;;  %v304_v13 = vmul.f32 %v300_v9, %v300_v9  ;;  %v302_v14 = vmul.f32 0.03125, %v298_v10  ;;  %v312_v21 = vsub.f32 %v288_v63, %v300_v9 }
 0x2a2   :  { %533 = vrsqrt.f32 %v307_v12  ;;  %v306_v11 = vsub.f32 %v302_v14, %v304_v13 }
 0x2a4   :  { %v308_v15 = vadd.f32 1e-06, %v306_v11 }
 0x2a6   :  { %535 = vrsqrt.f32 %v308_v15 }
 0x2ac   :  { %v534_v17 = vpop.eup %533 }
 0x2ad   :  { %v313_v19 = vmul.f32 %v534_v17, %v311_v16 }
 0x2af   :  { %v322_v22 = vmul.f32 %v355_v18, %v313_v19 }
 0x2b0   :  { %v536_v23 = vpop.eup %535 }
 0x2b1   :  { %v314_v24 = vmul.f32 %v536_v23, %v312_v21  ;;  %v331_v25 = vadd.f32 %v356_v20, %v322_v22 }
 0x2b3   :  { %v323_v26 = vmul.f32 %v355_v18, %v314_v24  ;;  %333 = vst [vmem:[#allocation9] sm:$0xff] %v331_v25 }
 0x2b5   :  { %v332_v27 = vadd.f32 %v356_v20, %v323_v26 }
 0x2b7   :  { %334 = vst [vmem:[#allocation9 + $0x8] sm:$0xff] %v332_v27 }
 0x2b8   :  { %614 = shalt.err (!%p611_p0)
}
 0x2b9   :  { %s615_s24 = scalar_lea.hbm %s767_s7, 256 }
 0x2ba   :  { %p616_p1 = scmp.ne.s32.totalorder %s767_s7, %s615_s24  ;;  %p619_p2 = scmp.lt.u32.totalorder %s615_s24, %s767_s7 }
 0x2bc   :  { %p621_p3 = pnand %p619_p2, %p616_p1 }
 0x2be   :  { %624 = shalt.err (!%p621_p3)
}
 0x2bf   :  { %346 = dma.vmem_to_hbm [thread:$0]  %s341_s22, 256, %s767_s7, [#allocation5], %s633_s13, %s633_s13, %s634_s14  }
 0x2c0   :  { %629 = dma.done.wait [#allocation5], 256  }
 0x2c1   :  { %630 = vsyncadd [#allocation5], 4294967040 }
 0x2c2   :  { %350 = vsyncpa [#allocation4], 1 }
 0x2c3   :  { %351 = vsyncpa [#allocation7], 1 }
 0x2c4   :  { %352 = vsyncpa [#allocation5], 1 }

</bundles_post_ra>
